<compile_context>
chip_gen: v6e
topology: v6e:2x2x1
jax: 0.10.0
libtpu: 0.0.40
codegen_flags: <defaults>
</compile_context>

<pallas_src>
import jax
import jax.numpy as jnp
from jax.experimental import pallas as pl
from jax.experimental.pallas import tpu as pltpu

_LANE = 128
_SUBLANE = 8


def _copy_kernel(x_ref, o_ref):
    o_ref[...] = x_ref[...]


def identity_map(x, *args, **kwargs):
    """Pallas implementation of IdentityMap.forward: returns x (bit-exact).

    Implemented as a lane-dense, VMEM-budgeted tiled copy (mem-bound; the grid
    axis is 'parallel' so both TCs are used on v7x).
    """
    del args, kwargs
    orig_shape = x.shape
    total = int(x.size)
    if total == 0:
        return x

    dt_bytes = jnp.dtype(x.dtype).itemsize

    # Fold the flattened tensor into a lane-dense (rows, lanes) slab.  lanes is
    # a large multiple of 128 (capped so tiny tensors don't over-pad), so every
    # store is an unmasked full-lane vst.
    lanes = _LANE
    while lanes < 4096 and (2 * lanes) * _SUBLANE <= total:
        lanes *= 2
    rows = pl.cdiv(total, lanes)

    # Tile rows from a VMEM byte budget: with default double buffering on both
    # the input and the output side, ~4 * block_bytes stays live — well under
    # the scoped VMEM defaults on v5e / v6e / v7x.
    block_bytes = 2 * 1024 * 1024
    max_tile_rows = max(
        _SUBLANE, (block_bytes // (lanes * dt_bytes)) // _SUBLANE * _SUBLANE
    )
    tile_rows = min(max_tile_rows, pl.cdiv(rows, _SUBLANE) * _SUBLANE)

    # Pad rows up to a whole number of tiles (padding < one tile) so the grid
    # divides evenly and the (8, 128) tiling constraint is always satisfied.
    grid_rows = pl.cdiv(rows, tile_rows) * tile_rows
    padded = grid_rows * lanes

    xf = x.reshape(-1)
    if padded != total:
        xf = jnp.pad(xf, (0, padded - total))
    x2 = xf.reshape(grid_rows, lanes)

    out = pl.pallas_call(
        _copy_kernel,
        out_shape=jax.ShapeDtypeStruct((grid_rows, lanes), x.dtype),
        grid=(grid_rows // tile_rows,),
        in_specs=[pl.BlockSpec((tile_rows, lanes), lambda i: (i, 0))],
        out_specs=pl.BlockSpec((tile_rows, lanes), lambda i: (i, 0)),
        compiler_params=pltpu.CompilerParams(
            dimension_semantics=("parallel",),  # megacore sharding on v7x
        ),
        cost_estimate=pl.CostEstimate(
            flops=0, transcendentals=0, bytes_accessed=2 * padded * dt_bytes
        ),
    )(x2)

    out = out.reshape(-1)
    if padded != total:
        out = out[:total]
    return out.reshape(orig_shape)


def identity_map_config():
    # Mirrors the PyTorch `config` property.
    return {"mm_resampler_type": "identity"}


if __name__ == "__main__":
    key = jax.random.PRNGKey(0)
    # IdentityMap(hiiden) creates no params; forward passes x through.
    batch, seq, hidden = 2, 8, 32
    x = jax.random.normal(key, (batch, seq, hidden), dtype=jnp.float32)

    y = jax.block_until_ready(identity_map(x))
    assert y.shape == x.shape and y.dtype == x.dtype
    assert bool(jnp.array_equal(y, x))

    # Awkward shape: row count not a multiple of 8, hidden not a multiple of
    # 128 (exercises the lane-dense fold + padding logic).
    x_odd = jax.random.normal(jax.random.PRNGKey(0), (3, 7, 20), dtype=jnp.float32)
    y_odd = jax.block_until_ready(identity_map(x_odd))
    assert y_odd.shape == x_odd.shape and bool(jnp.array_equal(y_odd, x_odd))

    # Different dtype (bf16) path.
    x_bf16 = x.astype(jnp.bfloat16)
    y_bf16 = jax.block_until_ready(identity_map(x_bf16))
    assert y_bf16.dtype == jnp.bfloat16 and bool(jnp.array_equal(y_bf16, x_bf16))

    assert identity_map_config() == {"mm_resampler_type": "identity"}
    print("KERNEL_OK")
</pallas_src>

<mosaic_0001>
module attributes {stable_mosaic.version = 11 : i64} {
  func.func @_copy_kernel(%arg0: i32, %arg1: memref<8x128xf32, #tpu.memory_space<vmem>>, %arg2: memref<8x128xf32, #tpu.memory_space<vmem>>) attributes {dimension_semantics = [#tpu.dimension_semantics<parallel>], iteration_bounds = array<i64: 1>, scalar_prefetch = 0 : i64, scratch_operands = 0 : i64, tpu.core_type = #tpu.core_type<tc>, window_params = [{transform_indices = @transform_0, window_bounds = array<i64: 8, 128>}, {transform_indices = @transform_1, window_bounds = array<i64: 8, 128>}]} {
    %c0 = arith.constant 0 : index
    %c0_0 = arith.constant 0 : index
    %0 = vector.load %arg1[%c0, %c0_0] : memref<8x128xf32, #tpu.memory_space<vmem>>, vector<8x128xf32>
    %c0_1 = arith.constant 0 : index
    %c0_2 = arith.constant 0 : index
    %1 = vector.load %arg2[%c0_1, %c0_2] : memref<8x128xf32, #tpu.memory_space<vmem>>, vector<8x128xf32>
    tpu.vector_store %arg2[%c0_1, %c0_2], %0 {strides = array<i32>} : memref<8x128xf32, #tpu.memory_space<vmem>>, vector<8x128xf32>,
    return
  }
  func.func @transform_0(%arg0: i32) -> (i32, i32) {
    %c0_i32 = arith.constant 0 : i32
    %c0_i32_0 = arith.constant 0 : i32
    return %arg0, %c0_i32 : i32, i32
  }
  func.func @transform_1(%arg0: i32) -> (i32, i32) {
    %c0_i32 = arith.constant 0 : i32
    %c0_i32_0 = arith.constant 0 : i32
    return %arg0, %c0_i32 : i32, i32
  }
}

</mosaic_0001>

<bundles_post_ra>
// kernel: tpu_custom_call.1
= control target key start
LH: loop header
LB: loop body
LE: loop exit
PB: predicated region body
PF: predicated region fallthrough
CT: control target
= control target key end

     0   :  { %6 = vsyncpa [#allocation3], 0  ;;  %s102_s0 = inlined_call_operand.hbm [shape: f32[8,128], index: 0, kind: input, shape index: {}]   ;;  %s103_s1 = inlined_call_operand.hbm [shape: f32[8,128], index: 1, kind: output, shape index: {}]  }
   0x1   :  { %7 = vsyncpa [#allocation4], 0  ;;  %s84_s6 = smov [#allocation2]  }
   0x2   :  { %s14_s7 = sshll.u32 %s84_s6, 4  ;;  %s15_s7 = int_to_ptr.vmem [resolvable:$true] %s14_s7 }
   0x3   :  { %s48_s8 = scalar_lea.vmem %s15_s7, 128  ;;  %p53_p1 = scmp.lt.s32.totalorder %s15_s7, %s15_s7 }
   0x4   :  { %p49_p0 = scmp.ne.s32.totalorder %s15_s7, %s48_s8  ;;  %p54_p2 = scmp.lt.s32.totalorder %s48_s8, %s48_s8 }
   0x6   :  { %p55_p3 = por %p54_p2, %p53_p1 }
   0x8   :  { %p56_p4 = pnand %p55_p3, %p49_p0 }
   0xa   :  { %59 = shalt.err (!%p56_p4)
}
   0xb   :  { %17 = dma.hbm_to_vmem [thread:$0]  %s102_s0, 128, %s15_s7, [#allocation3]  }
   0xc   :  { %80 = dma.done.wait [#allocation3], 128  }
   0xd   :  { %81 = vsyncadd [#allocation3], 4294967168  ;;  %s85_s11 = smov [#allocation5]   ;;  %v21_v0 = vld [vmem:[#allocation2] sm:$0xff] }
   0xe   :  { %s29_s12 = sshll.u32 %s85_s11, 4  ;;  %22 = vst [vmem:[#allocation5] sm:$0xff] %v21_v0  ;;  %s30_s12 = int_to_ptr.vmem [resolvable:$true] %s29_s12 }
   0xf   :  { %s60_s13 = scalar_lea.vmem %s30_s12, 128  ;;  %p65_p6 = scmp.lt.s32.totalorder %s30_s12, %s30_s12 }
  0x10   :  { %p61_p5 = scmp.ne.s32.totalorder %s30_s12, %s60_s13  ;;  %p66_p7 = scmp.lt.s32.totalorder %s60_s13, %s60_s13 }
  0x12   :  { %p67_p8 = por %p66_p7, %p65_p6 }
  0x14   :  { %p68_p9 = pnand %p67_p8, %p61_p5 }
  0x16   :  { %71 = shalt.err (!%p68_p9)
}
  0x17   :  { %32 = dma.vmem_to_hbm [thread:$0]  %s30_s12, 128, %s103_s1, [#allocation4]  }
  0x18   :  { %82 = dma.done.wait [#allocation4], 128  }
  0x19   :  { %83 = vsyncadd [#allocation4], 4294967168 }
  0x1a   :  { %36 = vsyncpa [#allocation3], 1 }
  0x1b   :  { %37 = vsyncpa [#allocation4], 1 }

</bundles_post_ra>
